<compile_context>
chip_gen: v7x
topology: tpu7x:2x2x1
jax: 0.10.0
libtpu: 0.0.40
codegen_flags: <defaults>
</compile_context>

<pallas_src>
import math

import jax
import jax.numpy as jnp
from jax.experimental import pallas as pl
from jax.experimental.pallas import tpu as pltpu


_LANE = 128
_SUBLANE = 8
_MIN_GRID_STEPS = 4          # keep some grid depth for megacore / pipelining
_DEFAULT_VMEM_CAP = 64 * 1024 * 1024


def _round_up(n, m):
    return ((n + m - 1) // m) * m


def _attention_kernel(x_ref, mask_ref, u_ref, out_ref, alpha_ref):
    mask = mask_ref[...]                              # (TB, L) int32, 1 => masked
    u = u_ref[...].astype(jnp.float32)                # (1, H)

    # ---- alpha path: v = tanh(x); vu = <v, u> over H; masked softmax ----
    # x is widened to f32 inline (single consumer -> no shared f32 tile).
    v = jnp.tanh(x_ref[...].astype(jnp.float32))      # (TB, L, H)
    vu = jnp.sum(v * u[jnp.newaxis, :, :], axis=-1)   # (TB, L) lane reduce
    # NOTE: an all-masked row yields NaN alpha, identical to torch.softmax
    # of an all -inf row.
    vu = jnp.where(mask != 0, jnp.float32(-jnp.inf), vu)

    # Numerically-stable softmax over L; EUP approximate reciprocal plus one
    # Newton-Raphson refinement instead of a full-precision divide.
    m = jnp.max(vu, axis=-1, keepdims=True)           # (TB, 1)
    e = jnp.exp(vu - m)                                # (TB, L)
    denom = jnp.sum(e, axis=-1, keepdims=True)         # (TB, 1)
    r = pl.reciprocal(denom, approx=True)
    r = r * (2.0 - denom * r)                          # NR step -> ~f32 accuracy
    alpha = e * r                                      # (TB, L)
    alpha_ref[...] = alpha.astype(alpha_ref.dtype)

    # ---- pooled output: out = tanh( sum_L alpha * x ) on the VPU ----
    # (second, independent read of the x tile in its native dtype; the q=1
    #  MXU contraction was dropped per review — M=1 wastes MXU rows and pays
    #  a per-batch weight reload.)
    w = x_ref[...].astype(jnp.float32) * alpha[:, :, jnp.newaxis]   # (TB, L, H)
    pooled = jnp.sum(w, axis=1)                                      # (TB, H)
    out_ref[...] = jnp.tanh(pooled).astype(out_ref.dtype)

    # TODO(synk): on v7x (3.2 TB/s/TC) the lane reduce for vu may become the
    # binding XLU slot; route it through the otherwise-idle MXU as a
    # (TB*L, H) @ (H, 1) matvec after confirming from the bundle dump.


def _vmem_limit_bytes():
    """Per-generation scoped-VMEM limit (≈3/4 of physical, capped at 96 MiB)."""
    try:
        info = pltpu.get_tpu_info()
        cap = getattr(info, "vmem_capacity_bytes", None) or _DEFAULT_VMEM_CAP
    except Exception:
        cap = _DEFAULT_VMEM_CAP
    return int(min(96 * 1024 * 1024, cap * 3 // 4))


def _pick_batch_tile(B, L, H, x_itemsize, tile_budget):
    """Largest batch tile whose double-buffered I/O + f32 temporaries fit."""
    sub_x = 16 if x_itemsize == 2 else 8
    ls_x = _round_up(L, sub_x)              # x tile sublane padding in VMEM
    l8 = _round_up(L, _SUBLANE)             # f32 temp sublane padding
    hl = _round_up(H, _LANE)                # lane padding
    ll = _round_up(L, _LANE)                # lane padding for (TB, L) blocks
    per_row = (2 * ls_x * hl * x_itemsize   # double-buffered x input tile
               + 3 * l8 * hl * 4            # f32 tanh / weighted / widen temporaries
               + 2 * 2 * ll * 4             # mask (i32) + alpha (f32), double-buffered
               + 2 * 2 * hl * 4)            # out tile + f32 pooled temp
    tb = max(1, int(tile_budget) // per_row)
    # Keep at least _MIN_GRID_STEPS grid steps when B allows (v7x megacore
    # sharding + pipeline depth); per-step overhead (~0.35 us) is negligible.
    tb = min(tb, max(1, pl.cdiv(B, _MIN_GRID_STEPS)))
    if tb >= B:
        return B
    # Sublane-align so 2-D (TB, L) / (TB, H) blocks satisfy the (8, 128) rule
    # (the 3-D x block is unconstrained on TB since its trailing dims are full).
    tb = max(_SUBLANE, (tb // _SUBLANE) * _SUBLANE)
    return int(min(tb, B))


def attention_forward(x, att_mask, u_omega):
    """x: (B, L, H) f32/bf16 ; att_mask: (B, L) bool (True => masked) ; u_omega: (1, H)."""
    B, L, H = x.shape
    x_dtype = x.dtype

    vmem_limit = _vmem_limit_bytes()
    TB = _pick_batch_tile(B, L, H, jnp.dtype(x_dtype).itemsize, vmem_limit // 2)
    grid = (pl.cdiv(B, TB),)

    # TODO(synk): when the caller's mask is length-based, replace it with
    # per-example lengths via PrefetchScalarGridSpec(num_scalar_prefetch=1)
    # and an in-kernel broadcasted_iota to drop the mask DMA entirely.
    mask_i = att_mask.astype(jnp.int32)          # (B, L), 1 => masked
    u_f = u_omega.astype(jnp.float32)            # (1, H)

    out, alpha = pl.pallas_call(
        _attention_kernel,
        out_shape=(
            jax.ShapeDtypeStruct((B, H), x_dtype),
            jax.ShapeDtypeStruct((B, L), jnp.float32),
        ),
        grid=grid,
        in_specs=[
            pl.BlockSpec((TB, L, H), lambda b: (b, 0, 0)),   # trailing dims = full
            pl.BlockSpec((TB, L), lambda b: (b, 0)),
            pl.BlockSpec((1, H), lambda b: (0, 0)),
        ],
        out_specs=(
            pl.BlockSpec((TB, H), lambda b: (b, 0)),          # dense 2-D store
            pl.BlockSpec((TB, L), lambda b: (b, 0)),
        ),
        compiler_params=pltpu.CompilerParams(
            dimension_semantics=("parallel",),
            vmem_limit_bytes=vmem_limit,
        ),
    )(x, mask_i, u_f)

    return out, alpha


def _reference(x, att_mask, u_omega):
    # Pure-JAX reference mirroring the PyTorch forward (all f32).
    xf = x.astype(jnp.float32)
    uf = u_omega.astype(jnp.float32)
    v = jnp.tanh(xf)
    vu = jnp.sum(v * uf[0][None, None, :], axis=-1)
    vu = jnp.where(att_mask, -jnp.inf, vu)
    alpha = jax.nn.softmax(vu, axis=-1)
    out = jnp.tanh(jnp.sum(xf * alpha[..., None], axis=1))
    return out, alpha


if __name__ == "__main__":
    B, L, H = 2, 8, 32

    key = jax.random.PRNGKey(0)
    kx, ku = jax.random.split(key)

    # Deterministic parameter init matching torch.randn(1, H) / sqrt(H).
    u_omega = jax.random.normal(ku, (1, H), dtype=jnp.float32) / math.sqrt(H)
    x = jax.random.normal(kx, (B, L, H), dtype=jnp.float32)

    # Mask: pad positions beyond per-example lengths (True => masked out).
    lengths = jnp.array([6, 4], dtype=jnp.int32)
    positions = jnp.arange(L, dtype=jnp.int32)[None, :]           # (1, L)
    att_mask = positions >= lengths[:, None]                      # (B, L) bool

    # ---- f32 path: check against pure-JAX reference. ----
    out, alpha = attention_forward(x, att_mask, u_omega)
    out = jax.block_until_ready(out)
    alpha = jax.block_until_ready(alpha)

    ref_out, ref_alpha = _reference(x, att_mask, u_omega)

    assert out.shape == (B, H) and alpha.shape == (B, L)
    assert jnp.allclose(out, ref_out, atol=1e-4, rtol=1e-4)
    assert jnp.allclose(alpha, ref_alpha, atol=1e-4, rtol=1e-4)
    # Masked positions must carry zero attention weight.
    assert jnp.allclose(jnp.where(att_mask, alpha, 0.0), 0.0)

    # ---- bf16 path: halves HBM traffic; structural smoke checks. ----
    out_bf, alpha_bf = attention_forward(x.astype(jnp.bfloat16), att_mask, u_omega)
    out_bf = jax.block_until_ready(out_bf)
    alpha_bf = jax.block_until_ready(alpha_bf)
    assert out_bf.shape == (B, H) and out_bf.dtype == jnp.bfloat16
    assert bool(jnp.all(jnp.isfinite(alpha_bf)))
    assert jnp.allclose(jnp.sum(alpha_bf, axis=-1), 1.0, atol=1e-2)
    assert jnp.allclose(jnp.where(att_mask, alpha_bf, 0.0), 0.0)

    print("KERNEL_OK")
</pallas_src>

<mosaic_0001>
module attributes {stable_mosaic.version = 11 : i64} {
  func.func @_attention_kernel(%arg0: i32, %arg1: memref<2x8x32xf32, #tpu.memory_space<vmem>>, %arg2: memref<2x8xi32, #tpu.memory_space<vmem>>, %arg3: memref<1x32xf32, #tpu.memory_space<vmem>>, %arg4: memref<2x32xf32, #tpu.memory_space<vmem>>, %arg5: memref<2x8xf32, #tpu.memory_space<vmem>>) attributes {dimension_semantics = [#tpu.dimension_semantics<parallel>], iteration_bounds = array<i64: 1>, scalar_prefetch = 0 : i64, scratch_operands = 0 : i64, tpu.core_type = #tpu.core_type<tc>, window_params = [{transform_indices = @transform_0, window_bounds = array<i64: 2, 8, 32>}, {transform_indices = @transform_1, window_bounds = array<i64: 2, 8>}, {pipeline_mode = #tpu.pipeline_mode<synchronous>, transform_indices = @transform_2, window_bounds = array<i64: 1, 32>}, {transform_indices = @transform_3, window_bounds = array<i64: 2, 32>}, {transform_indices = @transform_4, window_bounds = array<i64: 2, 8>}]} {
    %c0 = arith.constant 0 : index
    %c0_0 = arith.constant 0 : index
    %0 = vector.load %arg2[%c0, %c0_0] : memref<2x8xi32, #tpu.memory_space<vmem>>, vector<2x8xi32>
    %c0_1 = arith.constant 0 : index
    %c0_2 = arith.constant 0 : index
    %1 = vector.load %arg3[%c0_1, %c0_2] : memref<1x32xf32, #tpu.memory_space<vmem>>, vector<1x32xf32>
    %c0_3 = arith.constant 0 : index
    %c0_4 = arith.constant 0 : index
    %c0_5 = arith.constant 0 : index
    %2 = vector.load %arg1[%c0_3, %c0_4, %c0_5] : memref<2x8x32xf32, #tpu.memory_space<vmem>>, vector<2x8x32xf32>
    %3 = math.tanh %2 : vector<2x8x32xf32>
    %4 = vector.shape_cast %1 : vector<1x32xf32> to vector<1x1x32xf32>
    %5 = vector.broadcast %4 : vector<1x1x32xf32> to vector<2x8x32xf32>
    %6 = arith.mulf %3, %5 : vector<2x8x32xf32>
    %cst = arith.constant dense<0.000000e+00> : vector<2x8xf32>
    %7 = vector.multi_reduction <add>, %6, %cst [2] : vector<2x8x32xf32> to vector<2x8xf32>
    %c0_i32 = arith.constant 0 : i32
    %8 = vector.broadcast %c0_i32 : i32 to vector<2x8xi32>
    %9 = arith.cmpi ne, %0, %8 : vector<2x8xi32>
    %cst_6 = arith.constant 0xFF800000 : f32
    %10 = vector.broadcast %cst_6 : f32 to vector<2x8xf32>
    %11 = arith.select %9, %10, %7 : vector<2x8xi1>, vector<2x8xf32>
    %cst_7 = arith.constant dense<0xFF800000> : vector<2xf32>
    %12 = vector.multi_reduction <maximumf>, %11, %cst_7 [1] : vector<2x8xf32> to vector<2xf32>
    %13 = vector.shape_cast %12 : vector<2xf32> to vector<2x1xf32>
    %14 = vector.broadcast %13 : vector<2x1xf32> to vector<2x8xf32>
    %15 = arith.subf %11, %14 : vector<2x8xf32>
    %16 = math.exp %15 : vector<2x8xf32>
    %cst_8 = arith.constant dense<0.000000e+00> : vector<2xf32>
    %17 = vector.multi_reduction <add>, %16, %cst_8 [1] : vector<2x8xf32> to vector<2xf32>
    %18 = vector.shape_cast %17 : vector<2xf32> to vector<2x1xf32>
    %19 = tpu.reciprocal %18 {approx = true} : vector<2x1xf32> -> vector<2x1xf32>
    %20 = arith.mulf %18, %19 : vector<2x1xf32>
    %cst_9 = arith.constant 2.000000e+00 : f32
    %21 = vector.broadcast %cst_9 : f32 to vector<2x1xf32>
    %22 = arith.subf %21, %20 : vector<2x1xf32>
    %23 = arith.mulf %19, %22 : vector<2x1xf32>
    %24 = vector.broadcast %23 : vector<2x1xf32> to vector<2x8xf32>
    %25 = arith.mulf %16, %24 : vector<2x8xf32>
    %c0_10 = arith.constant 0 : index
    %c0_11 = arith.constant 0 : index
    %26 = vector.load %arg5[%c0_10, %c0_11] : memref<2x8xf32, #tpu.memory_space<vmem>>, vector<2x8xf32>
    tpu.vector_store %arg5[%c0_10, %c0_11], %25 {strides = array<i32>} : memref<2x8xf32, #tpu.memory_space<vmem>>, vector<2x8xf32>,
    %c0_12 = arith.constant 0 : index
    %c0_13 = arith.constant 0 : index
    %c0_14 = arith.constant 0 : index
    %27 = vector.load %arg1[%c0_12, %c0_13, %c0_14] : memref<2x8x32xf32, #tpu.memory_space<vmem>>, vector<2x8x32xf32>
    %28 = vector.shape_cast %25 : vector<2x8xf32> to vector<2x8x1xf32>
    %29 = vector.broadcast %28 : vector<2x8x1xf32> to vector<2x8x32xf32>
    %30 = arith.mulf %27, %29 : vector<2x8x32xf32>
    %cst_15 = arith.constant dense<0.000000e+00> : vector<2x32xf32>
    %31 = vector.multi_reduction <add>, %30, %cst_15 [1] : vector<2x8x32xf32> to vector<2x32xf32>
    %32 = math.tanh %31 : vector<2x32xf32>
    %c0_16 = arith.constant 0 : index
    %c0_17 = arith.constant 0 : index
    %33 = vector.load %arg4[%c0_16, %c0_17] : memref<2x32xf32, #tpu.memory_space<vmem>>, vector<2x32xf32>
    tpu.vector_store %arg4[%c0_16, %c0_17], %32 {strides = array<i32>} : memref<2x32xf32, #tpu.memory_space<vmem>>, vector<2x32xf32>,
    return
  }
  func.func @transform_0(%arg0: i32) -> (i32, i32, i32) {
    %c0_i32 = arith.constant 0 : i32
    %c0_i32_0 = arith.constant 0 : i32
    %c0_i32_1 = arith.constant 0 : i32
    return %arg0, %c0_i32, %c0_i32_0 : i32, i32, i32
  }
  func.func @transform_1(%arg0: i32) -> (i32, i32) {
    %c0_i32 = arith.constant 0 : i32
    %c0_i32_0 = arith.constant 0 : i32
    return %arg0, %c0_i32 : i32, i32
  }
  func.func @transform_2(%arg0: i32) -> (i32, i32) {
    %c0_i32 = arith.constant 0 : i32
    %c0_i32_0 = arith.constant 0 : i32
    %c0_i32_1 = arith.constant 0 : i32
    return %c0_i32, %c0_i32_0 : i32, i32
  }
  func.func @transform_3(%arg0: i32) -> (i32, i32) {
    %c0_i32 = arith.constant 0 : i32
    %c0_i32_0 = arith.constant 0 : i32
    return %arg0, %c0_i32 : i32, i32
  }
  func.func @transform_4(%arg0: i32) -> (i32, i32) {
    %c0_i32 = arith.constant 0 : i32
    %c0_i32_0 = arith.constant 0 : i32
    return %arg0, %c0_i32 : i32, i32
  }
}

</mosaic_0001>

<bundles_post_ra>
// kernel: tpu_custom_call.1
= control target key start
LH: loop header
LB: loop body
LE: loop exit
PB: predicated region body
PF: predicated region fallthrough
CT: control target
= control target key end

     0   :  { %10 = vsyncpa [#allocation3], 0  ;;  %s334_s0 = inlined_call_operand.hbm [shape: f32[2,8,32], index: 0, kind: input, shape index: {}]   ;;  %s335_s1 = inlined_call_operand.vmem [shape: s32[2,8], index: 1, kind: input, shape index: {}]   ;;  %s336_s2 = inlined_call_operand.vmem [shape: f32[1,32], index: 2, kind: input, shape index: {}]   ;;  %s337_s3 = inlined_call_operand.hbm [shape: f32[2,32], index: 3, kind: output, shape index: {0}]   ;;  %s338_s4 = inlined_call_operand.hbm [shape: f32[2,8], index: 4, kind: output, shape index: {1}]  }
   0x1   :  { %11 = vsyncpa [#allocation4], 0 }
   0x2   :  { %12 = vsyncpa [#allocation7], 0  ;;  %s245_s15 = smov [#allocation2]   ;;  %s173_s19 = scalar_lea.hbm %s334_s0, 256 }
   0x3   :  { %s18_s16 = sshll.u32 %s245_s15, 4  ;;  %p174_p0 = scmp.ne.s32.totalorder %s334_s0, %s173_s19  ;;  %s19_s16 = int_to_ptr.vmem [resolvable:$true] %s18_s16 }
   0x4   :  { %p177_p1 = scmp.lt.u32.totalorder %s173_s19, %s334_s0 }
   0x6   :  { %p179_p2 = pnand %p177_p1, %p174_p0 }
   0x8   :  { %182 = shalt.err (!%p179_p2)
}
   0x9   :  { %s183_s24 = scalar_lea.vmem %s19_s16, 256  ;;  %p188_p4 = scmp.lt.s32.totalorder %s19_s16, %s19_s16 }
   0xa   :  { %p184_p3 = scmp.ne.s32.totalorder %s19_s16, %s183_s24  ;;  %p189_p5 = scmp.lt.s32.totalorder %s183_s24, %s183_s24 }
   0xc   :  { %p190_p6 = por %p189_p5, %p188_p4 }
   0xe   :  { %p191_p7 = pnand %p190_p6, %p184_p3 }
  0x10   :  { %194 = shalt.err (!%p191_p7)
}
  0x11   :  { %s246_s25 = smov 128   ;;  %s247_s26 = smov 8  }
  0x12   :  { %24 = dma.hbm_to_vmem [thread:$0]  %s334_s0, 256, %s19_s16, [#allocation3], %s246_s25, %s246_s25, %s247_s26  }
  0x13   :  { %239 = dma.done.wait [#allocation3], 256  }
  0x14   :  { %240 = vsyncadd [#allocation3], 4294967040  ;;  %v287_v0 = vld [vmem:[#allocation2] sm:$0xff]  ;;  %v289_v1 = vld [vmem:[#allocation2 + $0x8] sm:$0xff]  ;;  %vm46_vm0 = vcmask 261120   ;;  %v56_v9 = vlaneseq  ;;  %vm66_vm1 = vcmask 1041409  }
  0x15   :  { %161 = vtanh.f32 %v287_v0  ;;  %v155_v2 = vld [vmem:[%s336_s2] ss:$0 sm:$0xff]  ;;  %vm70_vm3 = vcmask 58368  }
  0x16   :  { %163 = vtanh.f32 %v289_v1  ;;  %v57_v10 = vand.u32 127, %v56_v9  ;;  %v59_v11 = vshrl.u32 %v56_v9, 7  ;;  %v32_v14 = vld [vmem:[%s335_s1] sm:$0x3]  ;;  %s248_s1 = smov [#allocation6]  }
  0x17   :  { %vm53_vm2 = vcmp.ne.s32.totalorder %v32_v14, 0  ;;  %s142_s2 = sshll.u32 %s248_s1, 4  ;;  %s143_s2 = int_to_ptr.vmem [resolvable:$true] %s142_s2 }
  0x18   :  { %v60_v13 = vsub.s32 %v57_v10, %v59_v11  ;;  %v97_v31 = vsub.s32 1, %v59_v11  ;;  %v90_v32 = vsub.s32 0, %v59_v11  ;;  %s195_s6 = scalar_lea.vmem %s143_s2, 32  ;;  %p200_p9 = scmp.lt.s32.totalorder %s143_s2, %s143_s2 }
  0x19   :  { %p196_p8 = scmp.ne.s32.totalorder %s143_s2, %s195_s6  ;;  %p201_p10 = scmp.lt.s32.totalorder %s195_s6, %s195_s6 }
  0x1b   :  { %p202_p11 = por %p201_p10, %p200_p9 }
  0x1d   :  { %p203_p12 = pnand %p202_p11, %p196_p8 }
  0x1f   :  { %v162_v3 = vpop.eup %161 }
  0x20   :  { %v164_v4 = vpop.eup %163  ;;  %v44_v5 = vmul.f32 %v162_v3, %v155_v2 }
  0x21   :  { %v45_v6 = vmul.f32 %v164_v4, %v155_v2 }
  0x22   :  { %v47_v7 = vsel %vm46_vm0, %v44_v5, 0.0 }
  0x23   :  { %48 = vadd.xlane.f32.xlu0 %v47_v7  ;;  %v50_v8 = vsel %vm46_vm0, %v45_v6, 0.0 }
  0x27   :  { %51 = vadd.xlane.f32.xlu0 %v50_v8 }
  0xb0   :  { %v49_v12 = vpop.xlane.xlu0 %48 }
  0xb1   :  { %v61_v16 = vrot.slane %v49_v12, %v60_v13 }
  0xb4   :  { %v52_v15 = vpop.xlane.xlu0 %51 }
  0xb5   :  { %v65_v17 = vrot.slane %v52_v15, %v60_v13 }
  0xb7   :  { %v67_v18 = vsel %vm66_vm1, %v65_v17, %v61_v16 }
  0xb8   :  { %v69_v19 = vsel %vm53_vm2, -inf, %v67_v18 }
  0xb9   :  { %v71_v20 = vsel %vm70_vm3, %v69_v19, -inf }
  0xba   :  { %72 = vmax.xlane.f32.xlu1 %v71_v20 }
 0x147   :  { %v73_v21 = vpop.xlane.xlu1 %72 }
 0x148   :  { %v74_v22 = vsub.f32 %v69_v19, %v73_v21 }
 0x14a   :  { %v75_v23 = vmul.f32 1.442695, %v74_v22 }
 0x14c   :  { %165 = vpow2.f32 %v75_v23 }
 0x156   :  { %v166_v24 = vpop.eup %165 }
 0x157   :  { %v77_v25 = vsel %vm70_vm3, %v166_v24, 0.0 }
 0x158   :  { %78 = vadd.xlane.f32.xlu1 %v77_v25 }
 0x1e5   :  { %v79_v26 = vpop.xlane.xlu1 %78 }
 0x1e6   :  { %167 = vrcp.f32 %v79_v26 }
 0x1f0   :  { %v168_v27 = vpop.eup %167 }
 0x1f1   :  { %v81_v28 = vmul.f32 %v168_v27, %v79_v26 }
 0x1f3   :  { %v82_v29 = vsub.f32 2.0, %v81_v28 }
 0x1f5   :  { %v83_v30 = vmul.f32 %v168_v27, %v82_v29 }
 0x1f7   :  { %v84_v33 = vmul.f32 %v166_v24, %v83_v30 }
 0x1f9   :  { %v98_v34 = vrot.slane %v84_v33, %v97_v31  ;;  %85 = vst.msk [vmem:[#allocation6] sm:$0x3] %vm70_vm3, %v84_v33  ;;  %v91_v35 = vrot.slane %v84_v33, %v90_v32 }
 0x1fb   :  { %100 = vbcast.lane.b32.xlu1 %v98_v34, 256  ;;  %93 = vbcast.lane.b32.xlu0 %v91_v35, 256 }
 0x1fc   :  { %206 = shalt.err (!%p203_p12)
}
 0x1fd   :  { %s207_s9 = scalar_lea.hbm %s338_s4, 32 }
 0x1fe   :  { %p208_p13 = scmp.ne.s32.totalorder %s338_s4, %s207_s9  ;;  %p211_p0 = scmp.lt.u32.totalorder %s207_s9, %s338_s4 }
 0x200   :  { %p213_p1 = pnand %p211_p0, %p208_p13 }
 0x202   :  { %216 = shalt.err (!%p213_p1)
}
 0x203   :  { %145 = dma.vmem_to_hbm [thread:$0]  %s143_s2, 32, %s338_s4, [#allocation7]   ;;  %vm124_vm4 = vcmask 254976  }
 0x204   :  { %s249_s4 = smov [#allocation5]  }
 0x205   :  { %s132_s16 = sshll.u32 %s249_s4, 4  ;;  %s133_s16 = int_to_ptr.vmem [resolvable:$true] %s132_s16 }
 0x206   :  { %s217_s17 = scalar_lea.vmem %s133_s16, 32  ;;  %p222_p3 = scmp.lt.s32.totalorder %s133_s16, %s133_s16 }
 0x207   :  { %p218_p2 = scmp.ne.s32.totalorder %s133_s16, %s217_s17  ;;  %p223_p4 = scmp.lt.s32.totalorder %s217_s17, %s217_s17 }
 0x209   :  { %p224_p5 = por %p223_p4, %p222_p3 }
 0x20b   :  { %p225_p6 = pnand %p224_p5, %p218_p2 }
 0x26d   :  { %v101_v36 = vpop.permute.xlu1 %100  ;;  %v94_v37 = vpop.permute.xlu0 %93 }
 0x26e   :  { %v103_v38 = vmul.f32 %v101_v36, %v289_v1  ;;  %v102_v39 = vmul.f32 %v94_v37, %v287_v0 }
 0x270   :  { %v111_v40 = vsel %vm46_vm0, %v103_v38, 0.0  ;;  %v104_v41 = vsel %vm46_vm0, %v102_v39, 0.0 }
 0x271   :  { %v112_v42 = vrot.slane %v111_v40, 4  ;;  %v105_v43 = vrot.slane %v104_v41, 4 }
 0x273   :  { %v113_v44 = vadd.f32 %v112_v42, %v111_v40  ;;  %v106_v45 = vadd.f32 %v105_v43, %v104_v41 }
 0x275   :  { %v114_v46 = vrot.slane %v113_v44, 2  ;;  %v107_v47 = vrot.slane %v106_v45, 2 }
 0x277   :  { %v115_v48 = vadd.f32 %v114_v46, %v113_v44  ;;  %v108_v49 = vadd.f32 %v107_v47, %v106_v45 }
 0x279   :  { %v116_v50 = vrot.slane %v115_v48, 1  ;;  %v109_v51 = vrot.slane %v108_v49, 1 }
 0x27b   :  { %v117_v52 = vadd.f32 %v116_v50, %v115_v48  ;;  %v110_v53 = vadd.f32 %v109_v51, %v108_v49 }
 0x27d   :  { %169 = vtanh.f32 %v117_v52 }
 0x27e   :  { %171 = vtanh.f32 %v110_v53 }
 0x287   :  { %v170_v54 = vpop.eup %169 }
 0x288   :  { %v172_v55 = vpop.eup %171 }
 0x289   :  { %v122_v56 = vsel %vm66_vm1, %v170_v54, %v172_v55 }
 0x28a   :  { %125 = vst.msk [vmem:[#allocation5] sm:$0x3] %vm124_vm4, %v122_v56 }
 0x28b   :  { %228 = shalt.err (!%p225_p6)
}
 0x28c   :  { %s229_s20 = scalar_lea.hbm %s337_s3, 32 }
 0x28d   :  { %p230_p7 = scmp.ne.s32.totalorder %s337_s3, %s229_s20  ;;  %p233_p8 = scmp.lt.u32.totalorder %s229_s20, %s337_s3 }
 0x28f   :  { %p235_p9 = pnand %p233_p8, %p230_p7 }
 0x291   :  { %238 = shalt.err (!%p235_p9)
}
 0x292   :  { %135 = dma.vmem_to_hbm [thread:$0]  %s133_s16, 32, %s337_s3, [#allocation4]  }
 0x293   :  { %241 = dma.done.wait [#allocation4], 32  }
 0x294   :  { %242 = vsyncadd [#allocation4], 4294967264 }
 0x295   :  { %243 = dma.done.wait [#allocation7], 32  }
 0x296   :  { %244 = vsyncadd [#allocation7], 4294967264 }
 0x297   :  { %152 = vsyncpa [#allocation3], 1 }
 0x298   :  { %153 = vsyncpa [#allocation4], 1 }
 0x299   :  { %154 = vsyncpa [#allocation7], 1 }

</bundles_post_ra>
